<compile_context>
chip_gen: v7x
topology: tpu7x:2x2x1
jax: 0.10.0
libtpu: 0.0.40
codegen_flags: <defaults>
</compile_context>

<pallas_src>
import functools

import jax
import jax.numpy as jnp
import numpy as np
from jax.experimental import pallas as pl
from jax.experimental.pallas import tpu as pltpu


# ---------------------------------------------------------------------------
# Pass 1: fused Q/K/V projection (done once, not per query tile).
# ---------------------------------------------------------------------------
def _qkv_proj_kernel(x_ref, wq_ref, bq_ref, wk_ref, bk_ref, wv_ref, bv_ref,
                     q_ref, k_ref, v_ref, *, num_heads, atten_dim, scale,
                     compute_dtype):
    x = x_ref[0].astype(compute_dtype)                    # (st, D)

    # Lane-dense (st, D) @ (D, D) projections, f32 accumulation on the MXU.
    q = jnp.dot(x, wq_ref[...], preferred_element_type=jnp.float32) + bq_ref[...]
    k = jnp.dot(x, wk_ref[...], preferred_element_type=jnp.float32) + bk_ref[...]
    v = jnp.dot(x, wv_ref[...], preferred_element_type=jnp.float32) + bv_ref[...]
    q = q * scale                                          # fold 1/sqrt(ad) into Q once

    # Split heads once here (amortised over the whole pass, not per q-tile)
    # and emit the head-major (B, H, S, ad) layout the attention kernel reads.
    for h in range(num_heads):
        sl = slice(h * atten_dim, (h + 1) * atten_dim)
        q_ref[0, h] = q[:, sl].astype(compute_dtype)
        k_ref[0, h] = k[:, sl].astype(compute_dtype)
        v_ref[0, h] = v[:, sl].astype(compute_dtype)


# ---------------------------------------------------------------------------
# Pass 2: flash attention (batched over heads) + fused output projection.
# ---------------------------------------------------------------------------
def _flash_attn_kernel(q_ref, k_ref, v_ref, wo_ref, bo_ref, out_ref,
                       m_ref, l_ref, acc_ref, slab_ref, *, num_heads,
                       atten_dim, compute_dtype, approx_recip):
    ki = pl.program_id(2)

    @pl.when(ki == 0)
    def _():
        m_ref[...] = jnp.full(m_ref.shape, -jnp.inf, jnp.float32)
        l_ref[...] = jnp.zeros(l_ref.shape, jnp.float32)
        acc_ref[...] = jnp.zeros(acc_ref.shape, jnp.float32)

    q = q_ref[0]                                           # (H, sq, ad), pre-scaled
    k = k_ref[0]                                           # (H, sk, ad)
    v = v_ref[0]                                           # (H, sk, ad)

    # Batched-head scores on the MXU, f32 accumulation.
    s = jnp.einsum('hqd,hkd->hqk', q, k,
                   preferred_element_type=jnp.float32)     # (H, sq, sk)

    m_prev = m_ref[...]                                    # (H, sq, 1)
    m_new = jnp.maximum(m_prev, jnp.max(s, axis=-1, keepdims=True))
    alpha = jnp.exp(m_prev - m_new)                        # (H, sq, 1)
    p = jnp.exp(s - m_new)                                 # unnormalised, f32
    l_ref[...] = alpha * l_ref[...] + jnp.sum(p, axis=-1, keepdims=True)
    acc_ref[...] = alpha * acc_ref[...] + jnp.einsum(
        'hqk,hkd->hqd', p.astype(compute_dtype), v,
        preferred_element_type=jnp.float32)                # (H, sq, ad)
    m_ref[...] = m_new

    @pl.when(ki == pl.num_programs(2) - 1)
    def _():
        # Normalise after P@V: (H, sq, ad)-sized multiply instead of scaling
        # the (H, sq, sk) probability matrix every kv step.
        inv_l = pl.reciprocal(l_ref[...], approx=approx_recip)   # (H, sq, 1)
        head_out = acc_ref[...] * inv_l                          # (H, sq, ad) f32
        # Assemble the lane-dense (sq, D) slab once per query tile so the
        # output projection is a single K=D matmul (not H K=ad matmuls).
        for h in range(num_heads):
            sl = slice(h * atten_dim, (h + 1) * atten_dim)
            slab_ref[:, sl] = head_out[h].astype(compute_dtype)
        out = jnp.dot(slab_ref[...], wo_ref[...],
                      preferred_element_type=jnp.float32) + bo_ref[...]
        out_ref[0] = out.astype(out_ref.dtype)


# ---------------------------------------------------------------------------
# Host-side helpers: weight restack, VMEM-aware tile selection.
# ---------------------------------------------------------------------------
def _restack(w, b):
    """(H, D, ad) -> (D, H*ad);  (H, 1, ad) -> (1, H*ad)."""
    H, D, ad = w.shape
    return jnp.transpose(w, (1, 0, 2)).reshape(D, H * ad), b.reshape(1, H * ad)


def _vmem_budget_bytes():
    try:
        cap = int(pltpu.get_tpu_info().vmem_capacity_bytes)
    except Exception:
        cap = 64 * 1024 * 1024        # conservative (v7x per-core VMEM)
    return min((cap * 3) // 4, 100 * 1024 * 1024)


def _pick_tile(n, cap):
    """Largest divisor of n that is <= cap, preferring MXU-friendly multiples."""
    if n <= cap:
        return n
    for step in (256, 128, 8):
        best = None
        t = step
        while t <= cap:
            if n % t == 0:
                best = t
            t += step
        if best is not None:
            return best
    return n  # awkward length: fall back to the full extent (always legal)


def _proj_tile(S, D, bw, budget):
    def est(st):
        return (2 * st * D * 4          # x blocks (double buffered, f32)
                + 6 * st * D * bw       # q/k/v output blocks
                + 6 * D * D * bw + 24 * D
                + 4 * st * D * 4)       # f32 projection transients
    st = _pick_tile(S, 1024)
    while est(st) > budget and st > 128:
        new = _pick_tile(S, st // 2)
        if new >= st:
            break
        st = new
    return st


def _attn_tiles(S, D, H, bw, out_bw, budget):
    def est(sq, sk):
        return (2 * sq * D * bw                 # q blocks (double buffered)
                + 4 * sk * D * bw               # k + v blocks
                + 2 * sq * D * out_bw           # out blocks
                + 2 * D * D * bw + 8 * D        # Wo / bo
                + sq * D * 4 + sq * D * bw      # acc + slab scratch
                + 16 * H * sq                   # m / l scratch
                + H * sq * sk * (8 + bw))       # scores / p transients
    sq = _pick_tile(S, 512)
    sk = _pick_tile(S, 512)
    while est(sq, sk) > budget:
        if sk >= sq and sk > 128:
            new = _pick_tile(S, sk // 2)
            if new >= sk:
                break
            sk = new
        elif sq > 128:
            new = _pick_tile(S, sq // 2)
            if new >= sq:
                break
            sq = new
        else:
            break
    return sq, sk


# ---------------------------------------------------------------------------
# Public wrapper.
# ---------------------------------------------------------------------------
def multihead_attention(x, params, *, num_heads, compute_dtype=jnp.bfloat16):
    B, S, D = x.shape
    atten_dim = D // num_heads
    wq, bq, wk, bk, wv, bv, wo, bo = params

    cdt = jnp.dtype(compute_dtype)
    bw = cdt.itemsize
    exact = cdt == jnp.dtype(jnp.float32)

    # Host-side restack into lane-dense fused projection weights.
    wq_f, bq_f = _restack(wq, bq)
    wk_f, bk_f = _restack(wk, bk)
    wv_f, bv_f = _restack(wv, bv)
    wq_f, wk_f, wv_f, wo_c = (w.astype(compute_dtype)
                              for w in (wq_f, wk_f, wv_f, wo))
    bq_f, bk_f, bv_f, bo_c = (b.astype(jnp.float32)
                              for b in (bq_f, bk_f, bv_f, bo.reshape(1, D)))

    budget = _vmem_budget_bytes()
    scale = 1.0 / float(np.sqrt(atten_dim))

    # ---- Pass 1: fused Q/K/V projection (head-major bf16 outputs) ---------
    st = _proj_tile(S, D, bw, budget)
    proj_kernel = functools.partial(
        _qkv_proj_kernel, num_heads=num_heads, atten_dim=atten_dim,
        scale=scale, compute_dtype=compute_dtype)
    qkv_shape = jax.ShapeDtypeStruct((B, num_heads, S, atten_dim), compute_dtype)
    w_spec = pl.BlockSpec((D, D), lambda b, t: (0, 0))
    b_spec = pl.BlockSpec((1, D), lambda b, t: (0, 0))
    qkv_out_spec = pl.BlockSpec((1, num_heads, st, atten_dim),
                                lambda b, t: (b, 0, t, 0))

    q_hd, k_hd, v_hd = pl.pallas_call(
        proj_kernel,
        out_shape=(qkv_shape, qkv_shape, qkv_shape),
        grid_spec=pltpu.PrefetchScalarGridSpec(
            num_scalar_prefetch=0,
            grid=(B, S // st),
            in_specs=[
                pl.BlockSpec((1, st, D), lambda b, t: (b, t, 0)),   # x tile
                w_spec, b_spec,                                     # Wq, bq
                w_spec, b_spec,                                     # Wk, bk
                w_spec, b_spec,                                     # Wv, bv
            ],
            out_specs=(qkv_out_spec, qkv_out_spec, qkv_out_spec),
        ),
        compiler_params=pltpu.CompilerParams(
            dimension_semantics=("parallel", "parallel"),
            vmem_limit_bytes=budget),
    )(x, wq_f, bq_f, wk_f, bk_f, wv_f, bv_f)

    # ---- Pass 2: flash attention + fused output projection -----------------
    sq, sk = _attn_tiles(S, D, num_heads, bw, jnp.dtype(x.dtype).itemsize, budget)
    attn_kernel = functools.partial(
        _flash_attn_kernel, num_heads=num_heads, atten_dim=atten_dim,
        compute_dtype=compute_dtype, approx_recip=not exact)

    q_spec = pl.BlockSpec((1, num_heads, sq, atten_dim),
                          lambda b, qi, ki: (b, 0, qi, 0))
    kv_spec = pl.BlockSpec((1, num_heads, sk, atten_dim),
                           lambda b, qi, ki: (b, 0, ki, 0))

    return pl.pallas_call(
        attn_kernel,
        out_shape=jax.ShapeDtypeStruct((B, S, D), x.dtype),
        grid_spec=pltpu.PrefetchScalarGridSpec(
            num_scalar_prefetch=0,
            grid=(B, S // sq, S // sk),
            in_specs=[
                q_spec, kv_spec, kv_spec,
                pl.BlockSpec((D, D), lambda b, qi, ki: (0, 0)),     # Wo
                pl.BlockSpec((1, D), lambda b, qi, ki: (0, 0)),     # bo
            ],
            out_specs=pl.BlockSpec((1, sq, D), lambda b, qi, ki: (b, qi, 0)),
            scratch_shapes=[
                pltpu.VMEM((num_heads, sq, 1), jnp.float32),          # m
                pltpu.VMEM((num_heads, sq, 1), jnp.float32),          # l
                pltpu.VMEM((num_heads, sq, atten_dim), jnp.float32),  # acc
                pltpu.VMEM((sq, D), compute_dtype),                   # concat slab
            ],
        ),
        compiler_params=pltpu.CompilerParams(
            dimension_semantics=("parallel", "parallel", "arbitrary"),
            vmem_limit_bytes=budget),
    )(q_hd, k_hd, v_hd, wo_c, bo_c)


# ---------------------------------------------------------------------------
# Pure-JAX reference mirroring the torch module semantics.
# ---------------------------------------------------------------------------
def reference_mha(x, params, *, num_heads):
    wq, bq, wk, bk, wv, bv, wo, bo = params
    B, S, D = x.shape
    atten_dim = D // num_heads
    outs = []
    for h in range(num_heads):
        q = x @ wq[h] + bq[h]
        k = x @ wk[h] + bk[h]
        v = x @ wv[h] + bv[h]
        scores = jnp.einsum("bqd,bkd->bqk", q, k) / jnp.sqrt(jnp.float32(atten_dim))
        p = jax.nn.softmax(scores, axis=-1)
        outs.append(jnp.einsum("bqk,bkd->bqd", p, v))
    cat = jnp.concatenate(outs, axis=-1)
    return cat @ wo + bo


if __name__ == "__main__":
    # Small deterministic config: d_model=32, num_heads=4 -> atten_dim=8, B=2, S=8
    d_model, num_heads = 32, 4
    atten_dim = d_model // num_heads
    B, S = 2, 8

    key = jax.random.PRNGKey(0)
    keys = jax.random.split(key, 10)
    x = jax.random.normal(keys[0], (B, S, d_model), dtype=jnp.float32)

    scale = 0.1
    wq = scale * jax.random.normal(keys[1], (num_heads, d_model, atten_dim), jnp.float32)
    bq = scale * jax.random.normal(keys[2], (num_heads, 1, atten_dim), jnp.float32)
    wk = scale * jax.random.normal(keys[3], (num_heads, d_model, atten_dim), jnp.float32)
    bk = scale * jax.random.normal(keys[4], (num_heads, 1, atten_dim), jnp.float32)
    wv = scale * jax.random.normal(keys[5], (num_heads, d_model, atten_dim), jnp.float32)
    bv = scale * jax.random.normal(keys[6], (num_heads, 1, atten_dim), jnp.float32)
    wo = scale * jax.random.normal(keys[7], (d_model, d_model), jnp.float32)
    bo = scale * jax.random.normal(keys[8], (1, d_model), jnp.float32)

    params = (wq, bq, wk, bk, wv, bv, wo, bo)

    ref = reference_mha(x, params, num_heads=num_heads)

    # Exact-semantics check (f32 compute path, exact reciprocal).
    out_f32 = multihead_attention(x, params, num_heads=num_heads,
                                  compute_dtype=jnp.float32)
    out_f32 = jax.block_until_ready(out_f32)
    np.testing.assert_allclose(np.asarray(out_f32), np.asarray(ref),
                               rtol=1e-4, atol=1e-4)

    # Performance config (bf16 matmuls, f32 accumulation, approx reciprocal).
    # Note: approx reciprocal means softmax rows sum to ~1 +/- ~1e-3.
    out_bf16 = multihead_attention(x, params, num_heads=num_heads)
    out_bf16 = jax.block_until_ready(out_bf16)
    np.testing.assert_allclose(np.asarray(out_bf16), np.asarray(ref),
                               rtol=3e-2, atol=3e-2)

    print("KERNEL_OK")
</pallas_src>

<mosaic_0001>
module attributes {stable_mosaic.version = 11 : i64} {
  func.func @_qkv_proj_kernel(%arg0: i32, %arg1: i32, %arg2: memref<1x8x32xf32, #tpu.memory_space<vmem>>, %arg3: memref<32x32xf32, #tpu.memory_space<vmem>>, %arg4: memref<1x32xf32, #tpu.memory_space<vmem>>, %arg5: memref<32x32xf32, #tpu.memory_space<vmem>>, %arg6: memref<1x32xf32, #tpu.memory_space<vmem>>, %arg7: memref<32x32xf32, #tpu.memory_space<vmem>>, %arg8: memref<1x32xf32, #tpu.memory_space<vmem>>, %arg9: memref<1x4x8x8xf32, #tpu.memory_space<vmem>>, %arg10: memref<1x4x8x8xf32, #tpu.memory_space<vmem>>, %arg11: memref<1x4x8x8xf32, #tpu.memory_space<vmem>>) attributes {dimension_semantics = [#tpu.dimension_semantics<parallel>, #tpu.dimension_semantics<parallel>], iteration_bounds = array<i64: 2, 1>, scalar_prefetch = 0 : i64, scratch_operands = 0 : i64, tpu.core_type = #tpu.core_type<tc>, window_params = [{transform_indices = @transform_0, window_bounds = array<i64: 1, 8, 32>}, {pipeline_mode = #tpu.pipeline_mode<synchronous>, transform_indices = @transform_1, window_bounds = array<i64: 32, 32>}, {pipeline_mode = #tpu.pipeline_mode<synchronous>, transform_indices = @transform_2, window_bounds = array<i64: 1, 32>}, {pipeline_mode = #tpu.pipeline_mode<synchronous>, transform_indices = @transform_3, window_bounds = array<i64: 32, 32>}, {pipeline_mode = #tpu.pipeline_mode<synchronous>, transform_indices = @transform_4, window_bounds = array<i64: 1, 32>}, {pipeline_mode = #tpu.pipeline_mode<synchronous>, transform_indices = @transform_5, window_bounds = array<i64: 32, 32>}, {pipeline_mode = #tpu.pipeline_mode<synchronous>, transform_indices = @transform_6, window_bounds = array<i64: 1, 32>}, {transform_indices = @transform_7, window_bounds = array<i64: 1, 4, 8, 8>}, {transform_indices = @transform_8, window_bounds = array<i64: 1, 4, 8, 8>}, {transform_indices = @transform_9, window_bounds = array<i64: 1, 4, 8, 8>}]} {
    %c0 = arith.constant 0 : index
    %c0_0 = arith.constant 0 : index
    %c0_1 = arith.constant 0 : index
    %0 = vector.load %arg2[%c0, %c0_0, %c0_1] : memref<1x8x32xf32, #tpu.memory_space<vmem>>, vector<1x8x32xf32>
    %1 = vector.shape_cast %0 : vector<1x8x32xf32> to vector<8x32xf32>
    %c0_2 = arith.constant 0 : index
    %c0_3 = arith.constant 0 : index
    %2 = vector.load %arg3[%c0_2, %c0_3] : memref<32x32xf32, #tpu.memory_space<vmem>>, vector<32x32xf32>
    %cst = arith.constant dense<0.000000e+00> : vector<8x32xf32>
    %3 = tpu.matmul %1, %2, %cst {dimension_numbers = #tpu.dot_dimension_numbers<[1], [0], [0], [1], [0, 0, 1, 1], [], []>} : vector<8x32xf32>, vector<32x32xf32>, vector<8x32xf32> -> vector<8x32xf32>
    %c0_4 = arith.constant 0 : index
    %c0_5 = arith.constant 0 : index
    %4 = vector.load %arg4[%c0_4, %c0_5] : memref<1x32xf32, #tpu.memory_space<vmem>>, vector<1x32xf32>
    %5 = vector.broadcast %4 : vector<1x32xf32> to vector<8x32xf32>
    %6 = arith.addf %3, %5 : vector<8x32xf32>
    %c0_6 = arith.constant 0 : index
    %c0_7 = arith.constant 0 : index
    %7 = vector.load %arg5[%c0_6, %c0_7] : memref<32x32xf32, #tpu.memory_space<vmem>>, vector<32x32xf32>
    %cst_8 = arith.constant dense<0.000000e+00> : vector<8x32xf32>
    %8 = tpu.matmul %1, %7, %cst_8 {dimension_numbers = #tpu.dot_dimension_numbers<[1], [0], [0], [1], [0, 0, 1, 1], [], []>} : vector<8x32xf32>, vector<32x32xf32>, vector<8x32xf32> -> vector<8x32xf32>
    %c0_9 = arith.constant 0 : index
    %c0_10 = arith.constant 0 : index
    %9 = vector.load %arg6[%c0_9, %c0_10] : memref<1x32xf32, #tpu.memory_space<vmem>>, vector<1x32xf32>
    %10 = vector.broadcast %9 : vector<1x32xf32> to vector<8x32xf32>
    %11 = arith.addf %8, %10 : vector<8x32xf32>
    %c0_11 = arith.constant 0 : index
    %c0_12 = arith.constant 0 : index
    %12 = vector.load %arg7[%c0_11, %c0_12] : memref<32x32xf32, #tpu.memory_space<vmem>>, vector<32x32xf32>
    %cst_13 = arith.constant dense<0.000000e+00> : vector<8x32xf32>
    %13 = tpu.matmul %1, %12, %cst_13 {dimension_numbers = #tpu.dot_dimension_numbers<[1], [0], [0], [1], [0, 0, 1, 1], [], []>} : vector<8x32xf32>, vector<32x32xf32>, vector<8x32xf32> -> vector<8x32xf32>
    %c0_14 = arith.constant 0 : index
    %c0_15 = arith.constant 0 : index
    %14 = vector.load %arg8[%c0_14, %c0_15] : memref<1x32xf32, #tpu.memory_space<vmem>>, vector<1x32xf32>
    %15 = vector.broadcast %14 : vector<1x32xf32> to vector<8x32xf32>
    %16 = arith.addf %13, %15 : vector<8x32xf32>
    %cst_16 = arith.constant 0.353553385 : f32
    %17 = vector.broadcast %cst_16 : f32 to vector<8x32xf32>
    %18 = arith.mulf %6, %17 : vector<8x32xf32>
    %19 = vector.extract_strided_slice %18 {offsets = [0, 0], sizes = [8, 8], strides = [1, 1]} : vector<8x32xf32> to vector<8x8xf32>
    %c0_17 = arith.constant 0 : index
    %c0_18 = arith.constant 0 : index
    %c0_19 = arith.constant 0 : index
    %c0_20 = arith.constant 0 : index
    %20 = vector.load %arg9[%c0_17, %c0_18, %c0_19, %c0_20] : memref<1x4x8x8xf32, #tpu.memory_space<vmem>>, vector<1x1x8x8xf32>
    %21 = vector.shape_cast %20 : vector<1x1x8x8xf32> to vector<8x8xf32>
    %22 = vector.shape_cast %19 : vector<8x8xf32> to vector<1x1x8x8xf32>
    tpu.vector_store %arg9[%c0_17, %c0_18, %c0_19, %c0_20], %22 {strides = array<i32>} : memref<1x4x8x8xf32, #tpu.memory_space<vmem>>, vector<1x1x8x8xf32>,
    %23 = vector.extract_strided_slice %11 {offsets = [0, 0], sizes = [8, 8], strides = [1, 1]} : vector<8x32xf32> to vector<8x8xf32>
    %c0_21 = arith.constant 0 : index
    %c0_22 = arith.constant 0 : index
    %c0_23 = arith.constant 0 : index
    %c0_24 = arith.constant 0 : index
    %24 = vector.load %arg10[%c0_21, %c0_22, %c0_23, %c0_24] : memref<1x4x8x8xf32, #tpu.memory_space<vmem>>, vector<1x1x8x8xf32>
    %25 = vector.shape_cast %24 : vector<1x1x8x8xf32> to vector<8x8xf32>
    %26 = vector.shape_cast %23 : vector<8x8xf32> to vector<1x1x8x8xf32>
    tpu.vector_store %arg10[%c0_21, %c0_22, %c0_23, %c0_24], %26 {strides = array<i32>} : memref<1x4x8x8xf32, #tpu.memory_space<vmem>>, vector<1x1x8x8xf32>,
    %27 = vector.extract_strided_slice %16 {offsets = [0, 0], sizes = [8, 8], strides = [1, 1]} : vector<8x32xf32> to vector<8x8xf32>
    %c0_25 = arith.constant 0 : index
    %c0_26 = arith.constant 0 : index
    %c0_27 = arith.constant 0 : index
    %c0_28 = arith.constant 0 : index
    %28 = vector.load %arg11[%c0_25, %c0_26, %c0_27, %c0_28] : memref<1x4x8x8xf32, #tpu.memory_space<vmem>>, vector<1x1x8x8xf32>
    %29 = vector.shape_cast %28 : vector<1x1x8x8xf32> to vector<8x8xf32>
    %30 = vector.shape_cast %27 : vector<8x8xf32> to vector<1x1x8x8xf32>
    tpu.vector_store %arg11[%c0_25, %c0_26, %c0_27, %c0_28], %30 {strides = array<i32>} : memref<1x4x8x8xf32, #tpu.memory_space<vmem>>, vector<1x1x8x8xf32>,
    %31 = vector.extract_strided_slice %18 {offsets = [0, 8], sizes = [8, 8], strides = [1, 1]} : vector<8x32xf32> to vector<8x8xf32>
    %c0_29 = arith.constant 0 : index
    %c1 = arith.constant 1 : index
    %c0_30 = arith.constant 0 : index
    %c0_31 = arith.constant 0 : index
    %32 = vector.load %arg9[%c0_29, %c1, %c0_30, %c0_31] : memref<1x4x8x8xf32, #tpu.memory_space<vmem>>, vector<1x1x8x8xf32>
    %33 = vector.shape_cast %32 : vector<1x1x8x8xf32> to vector<8x8xf32>
    %34 = vector.shape_cast %31 : vector<8x8xf32> to vector<1x1x8x8xf32>
    tpu.vector_store %arg9[%c0_29, %c1, %c0_30, %c0_31], %34 {strides = array<i32>} : memref<1x4x8x8xf32, #tpu.memory_space<vmem>>, vector<1x1x8x8xf32>,
    %35 = vector.extract_strided_slice %11 {offsets = [0, 8], sizes = [8, 8], strides = [1, 1]} : vector<8x32xf32> to vector<8x8xf32>
    %c0_32 = arith.constant 0 : index
    %c1_33 = arith.constant 1 : index
    %c0_34 = arith.constant 0 : index
    %c0_35 = arith.constant 0 : index
    %36 = vector.load %arg10[%c0_32, %c1_33, %c0_34, %c0_35] : memref<1x4x8x8xf32, #tpu.memory_space<vmem>>, vector<1x1x8x8xf32>
    %37 = vector.shape_cast %36 : vector<1x1x8x8xf32> to vector<8x8xf32>
    %38 = vector.shape_cast %35 : vector<8x8xf32> to vector<1x1x8x8xf32>
    tpu.vector_store %arg10[%c0_32, %c1_33, %c0_34, %c0_35], %38 {strides = array<i32>} : memref<1x4x8x8xf32, #tpu.memory_space<vmem>>, vector<1x1x8x8xf32>,
    %39 = vector.extract_strided_slice %16 {offsets = [0, 8], sizes = [8, 8], strides = [1, 1]} : vector<8x32xf32> to vector<8x8xf32>
    %c0_36 = arith.constant 0 : index
    %c1_37 = arith.constant 1 : index
    %c0_38 = arith.constant 0 : index
    %c0_39 = arith.constant 0 : index
    %40 = vector.load %arg11[%c0_36, %c1_37, %c0_38, %c0_39] : memref<1x4x8x8xf32, #tpu.memory_space<vmem>>, vector<1x1x8x8xf32>
    %41 = vector.shape_cast %40 : vector<1x1x8x8xf32> to vector<8x8xf32>
    %42 = vector.shape_cast %39 : vector<8x8xf32> to vector<1x1x8x8xf32>
    tpu.vector_store %arg11[%c0_36, %c1_37, %c0_38, %c0_39], %42 {strides = array<i32>} : memref<1x4x8x8xf32, #tpu.memory_space<vmem>>, vector<1x1x8x8xf32>,
    %43 = vector.extract_strided_slice %18 {offsets = [0, 16], sizes = [8, 8], strides = [1, 1]} : vector<8x32xf32> to vector<8x8xf32>
    %c0_40 = arith.constant 0 : index
    %c2 = arith.constant 2 : index
    %c0_41 = arith.constant 0 : index
    %c0_42 = arith.constant 0 : index
    %44 = vector.load %arg9[%c0_40, %c2, %c0_41, %c0_42] : memref<1x4x8x8xf32, #tpu.memory_space<vmem>>, vector<1x1x8x8xf32>
    %45 = vector.shape_cast %44 : vector<1x1x8x8xf32> to vector<8x8xf32>
    %46 = vector.shape_cast %43 : vector<8x8xf32> to vector<1x1x8x8xf32>
    tpu.vector_store %arg9[%c0_40, %c2, %c0_41, %c0_42], %46 {strides = array<i32>} : memref<1x4x8x8xf32, #tpu.memory_space<vmem>>, vector<1x1x8x8xf32>,
    %47 = vector.extract_strided_slice %11 {offsets = [0, 16], sizes = [8, 8], strides = [1, 1]} : vector<8x32xf32> to vector<8x8xf32>
    %c0_43 = arith.constant 0 : index
    %c2_44 = arith.constant 2 : index
    %c0_45 = arith.constant 0 : index
    %c0_46 = arith.constant 0 : index
    %48 = vector.load %arg10[%c0_43, %c2_44, %c0_45, %c0_46] : memref<1x4x8x8xf32, #tpu.memory_space<vmem>>, vector<1x1x8x8xf32>
    %49 = vector.shape_cast %48 : vector<1x1x8x8xf32> to vector<8x8xf32>
    %50 = vector.shape_cast %47 : vector<8x8xf32> to vector<1x1x8x8xf32>
    tpu.vector_store %arg10[%c0_43, %c2_44, %c0_45, %c0_46], %50 {strides = array<i32>} : memref<1x4x8x8xf32, #tpu.memory_space<vmem>>, vector<1x1x8x8xf32>,
    %51 = vector.extract_strided_slice %16 {offsets = [0, 16], sizes = [8, 8], strides = [1, 1]} : vector<8x32xf32> to vector<8x8xf32>
    %c0_47 = arith.constant 0 : index
    %c2_48 = arith.constant 2 : index
    %c0_49 = arith.constant 0 : index
    %c0_50 = arith.constant 0 : index
    %52 = vector.load %arg11[%c0_47, %c2_48, %c0_49, %c0_50] : memref<1x4x8x8xf32, #tpu.memory_space<vmem>>, vector<1x1x8x8xf32>
    %53 = vector.shape_cast %52 : vector<1x1x8x8xf32> to vector<8x8xf32>
    %54 = vector.shape_cast %51 : vector<8x8xf32> to vector<1x1x8x8xf32>
    tpu.vector_store %arg11[%c0_47, %c2_48, %c0_49, %c0_50], %54 {strides = array<i32>} : memref<1x4x8x8xf32, #tpu.memory_space<vmem>>, vector<1x1x8x8xf32>,
    %55 = vector.extract_strided_slice %18 {offsets = [0, 24], sizes = [8, 8], strides = [1, 1]} : vector<8x32xf32> to vector<8x8xf32>
    %c0_51 = arith.constant 0 : index
    %c3 = arith.constant 3 : index
    %c0_52 = arith.constant 0 : index
    %c0_53 = arith.constant 0 : index
    %56 = vector.load %arg9[%c0_51, %c3, %c0_52, %c0_53] : memref<1x4x8x8xf32, #tpu.memory_space<vmem>>, vector<1x1x8x8xf32>
    %57 = vector.shape_cast %56 : vector<1x1x8x8xf32> to vector<8x8xf32>
    %58 = vector.shape_cast %55 : vector<8x8xf32> to vector<1x1x8x8xf32>
    tpu.vector_store %arg9[%c0_51, %c3, %c0_52, %c0_53], %58 {strides = array<i32>} : memref<1x4x8x8xf32, #tpu.memory_space<vmem>>, vector<1x1x8x8xf32>,
    %59 = vector.extract_strided_slice %11 {offsets = [0, 24], sizes = [8, 8], strides = [1, 1]} : vector<8x32xf32> to vector<8x8xf32>
    %c0_54 = arith.constant 0 : index
    %c3_55 = arith.constant 3 : index
    %c0_56 = arith.constant 0 : index
    %c0_57 = arith.constant 0 : index
    %60 = vector.load %arg10[%c0_54, %c3_55, %c0_56, %c0_57] : memref<1x4x8x8xf32, #tpu.memory_space<vmem>>, vector<1x1x8x8xf32>
    %61 = vector.shape_cast %60 : vector<1x1x8x8xf32> to vector<8x8xf32>
    %62 = vector.shape_cast %59 : vector<8x8xf32> to vector<1x1x8x8xf32>
    tpu.vector_store %arg10[%c0_54, %c3_55, %c0_56, %c0_57], %62 {strides = array<i32>} : memref<1x4x8x8xf32, #tpu.memory_space<vmem>>, vector<1x1x8x8xf32>,
    %63 = vector.extract_strided_slice %16 {offsets = [0, 24], sizes = [8, 8], strides = [1, 1]} : vector<8x32xf32> to vector<8x8xf32>
    %c0_58 = arith.constant 0 : index
    %c3_59 = arith.constant 3 : index
    %c0_60 = arith.constant 0 : index
    %c0_61 = arith.constant 0 : index
    %64 = vector.load %arg11[%c0_58, %c3_59, %c0_60, %c0_61] : memref<1x4x8x8xf32, #tpu.memory_space<vmem>>, vector<1x1x8x8xf32>
    %65 = vector.shape_cast %64 : vector<1x1x8x8xf32> to vector<8x8xf32>
    %66 = vector.shape_cast %63 : vector<8x8xf32> to vector<1x1x8x8xf32>
    tpu.vector_store %arg11[%c0_58, %c3_59, %c0_60, %c0_61], %66 {strides = array<i32>} : memref<1x4x8x8xf32, #tpu.memory_space<vmem>>, vector<1x1x8x8xf32>,
    return
  }
  func.func @transform_0(%arg0: i32, %arg1: i32) -> (i32, i32, i32) {
    %c0_i32 = arith.constant 0 : i32
    %c0_i32_0 = arith.constant 0 : i32
    return %arg0, %arg1, %c0_i32 : i32, i32, i32
  }
  func.func @transform_1(%arg0: i32, %arg1: i32) -> (i32, i32) {
    %c0_i32 = arith.constant 0 : i32
    %c0_i32_0 = arith.constant 0 : i32
    %c0_i32_1 = arith.constant 0 : i32
    return %c0_i32, %c0_i32_0 : i32, i32
  }
  func.func @transform_2(%arg0: i32, %arg1: i32) -> (i32, i32) {
    %c0_i32 = arith.constant 0 : i32
    %c0_i32_0 = arith.constant 0 : i32
    %c0_i32_1 = arith.constant 0 : i32
    return %c0_i32, %c0_i32_0 : i32, i32
  }
  func.func @transform_3(%arg0: i32, %arg1: i32) -> (i32, i32) {
    %c0_i32 = arith.constant 0 : i32
    %c0_i32_0 = arith.constant 0 : i32
    %c0_i32_1 = arith.constant 0 : i32
    return %c0_i32, %c0_i32_0 : i32, i32
  }
  func.func @transform_4(%arg0: i32, %arg1: i32) -> (i32, i32) {
    %c0_i32 = arith.constant 0 : i32
    %c0_i32_0 = arith.constant 0 : i32
    %c0_i32_1 = arith.constant 0 : i32
    return %c0_i32, %c0_i32_0 : i32, i32
  }
  func.func @transform_5(%arg0: i32, %arg1: i32) -> (i32, i32) {
    %c0_i32 = arith.constant 0 : i32
    %c0_i32_0 = arith.constant 0 : i32
    %c0_i32_1 = arith.constant 0 : i32
    return %c0_i32, %c0_i32_0 : i32, i32
  }
  func.func @transform_6(%arg0: i32, %arg1: i32) -> (i32, i32) {
    %c0_i32 = arith.constant 0 : i32
    %c0_i32_0 = arith.constant 0 : i32
    %c0_i32_1 = arith.constant 0 : i32
    return %c0_i32, %c0_i32_0 : i32, i32
  }
  func.func @transform_7(%arg0: i32, %arg1: i32) -> (i32, i32, i32, i32) {
    %c0_i32 = arith.constant 0 : i32
    %c0_i32_0 = arith.constant 0 : i32
    %c0_i32_1 = arith.constant 0 : i32
    return %arg0, %c0_i32, %arg1, %c0_i32_0 : i32, i32, i32, i32
  }
  func.func @transform_8(%arg0: i32, %arg1: i32) -> (i32, i32, i32, i32) {
    %c0_i32 = arith.constant 0 : i32
    %c0_i32_0 = arith.constant 0 : i32
    %c0_i32_1 = arith.constant 0 : i32
    return %arg0, %c0_i32, %arg1, %c0_i32_0 : i32, i32, i32, i32
  }
  func.func @transform_9(%arg0: i32, %arg1: i32) -> (i32, i32, i32, i32) {
    %c0_i32 = arith.constant 0 : i32
    %c0_i32_0 = arith.constant 0 : i32
    %c0_i32_1 = arith.constant 0 : i32
    return %arg0, %c0_i32, %arg1, %c0_i32_0 : i32, i32, i32, i32
  }
}

</mosaic_0001>

<bundles_post_ra>
// kernel: tpu_custom_call.1
= control target key start
LH: loop header
LB: loop body
LE: loop exit
PB: predicated region body
PF: predicated region fallthrough
CT: control target
= control target key end

     0   :  { %s1939_s0 = inlined_call_operand.hbm [shape: f32[2,8,32], index: 0, kind: input, shape index: {}]   ;;  %s1940_s1 = inlined_call_operand.hbm [shape: f32[32,32], index: 1, kind: input, shape index: {}]   ;;  %s1941_s2 = inlined_call_operand.vmem [shape: f32[1,32], index: 2, kind: input, shape index: {}]   ;;  %s1942_s3 = inlined_call_operand.hbm [shape: f32[32,32], index: 3, kind: input, shape index: {}]   ;;  %s1943_s4 = inlined_call_operand.vmem [shape: f32[1,32], index: 4, kind: input, shape index: {}]   ;;  %s1944_s5 = inlined_call_operand.hbm [shape: f32[32,32], index: 5, kind: input, shape index: {}]   ;;  %s1945_s6 = inlined_call_operand.vmem [shape: f32[1,32], index: 6, kind: input, shape index: {}]   ;;  %s1946_s7 = inlined_call_operand.hbm [shape: f32[2,4,8,8], index: 7, kind: output, shape index: {0}]   ;;  %s1947_s8 = inlined_call_operand.hbm [shape: f32[2,4,8,8], index: 8, kind: output, shape index: {1}]   ;;  %s1948_s9 = inlined_call_operand.hbm [shape: f32[2,4,8,8], index: 9, kind: output, shape index: {2}]  }
   0x1   :  { %1960 = sst [smem:[#allocation21_spill]] %s1946_s7 }
   0x2   :  { %1961 = sst [smem:[#allocation22_spill]] %s1947_s8 }
   0x3   :  { %1962 = sst [smem:[#allocation23_spill]] %s1948_s9 }
   0x4   :  { %15 = vsyncpa [#allocation3], 0 }
   0x5   :  { %17 = vsyncpa [#allocation3 + $0x1], 0 }
   0x6   :  { %18 = vsyncpa [#allocation6], 0 }
   0x7   :  { %19 = vsyncpa [#allocation9], 0 }
   0x8   :  { %20 = vsyncpa [#allocation4], 0 }
   0x9   :  { %22 = vsyncpa [#allocation4 + $0x1], 0 }
   0xa   :  { %23 = vsyncpa [#allocation12], 0 }
   0xb   :  { %25 = vsyncpa [#allocation12 + $0x1], 0  ;;  %s1527_s30 = smov 0   ;;  %s1529_s10 = smov 0  }
   0xc   :  { %s1531_s11 = smov 0   ;;  %s1533_s12 = smov 0  }
   0xd   :  { %s1535_s13 = smov 0   ;;  %s1537_s14 = smov 0  }
   0xe LB: > { %1963 = sst [smem:[#allocation19_spill]] %s1438_s30  ;;  %s1558_s15 = sadd.s32 4294967295, %s1458_s14   ;;  %s1458_s14 = sphi %s1537_s14, %s31_s14   ;;  %s1454_s13 = sphi %s1535_s13, %s1994_s13   ;;  %s1450_s12 = sphi %s1533_s12, %s1993_s12   ;;  %s1446_s11 = sphi %s1531_s11, %s1992_s11   ;;  %s1442_s10 = sphi %s1529_s10, %s1991_s10   ;;  %s1438_s30 = sphi %s1527_s30, %s1990_s30  }
   0xf   : > { %s1949_s16 = sadd.s32 4294967294, %s1458_s14   ;;  %p65_p0 = scmp.ne.s32.totalorder %s1442_s10, %s1438_s30 }
  0x10   : > { %p1951_p1 = scmp.eq.s32.totalorder %s1558_s15, 0  ;;  %p223_p3 = scmp.eq.s32.totalorder %s1949_s16, 1 }
  0x11   : > { %p971_p5 = scmp.ge.s32.totalorder %s1458_s14, 1  ;;  %p286_p7 = scmp.lt.s32.totalorder %s1458_s14, 3 }
  0x12   : > { %p1569_p4 = por %p1951_p1, %p65_p0  ;;  %p1574_p6 = por %p223_p3, %p65_p0 }
  0x13   : > { %p1579_p8 = pnand %p971_p5, %p286_p7  ;;  %s1460_s20 = smov [#allocation5]  }
  0x14   : > { %s1964_s17 = scalar_select %p1569_p4, 1, 0 }
  0x15   : > { %s1965_s18 = scalar_select %p1574_p6, 1, 0 }
  0x16   : > { %s1967_s19 = scalar_select %p1579_p8, 1, 0 }
  0x17   : > { %1966 = sst [smem:[#allocation20_spill]] %s1965_s18  ;;  %s298_s21 = sshll.u32 %s1460_s20, 4  ;;  %s1583_s21 = int_to_ptr.vmem [resolvable:$true] %s298_s21 }
  0x18   : > { %p1101_p9 = pneg %p1579_p8  ;;  %s1461_s23 = smov [#allocation7]  }
  0x19   : > { %s314_s24 = sshll.u32 %s1461_s23, 4  ;;  %s1462_s25 = smov [#allocation8]   ;;  %s1594_s24 = int_to_ptr.vmem [resolvable:$true] %s314_s24 }
  0x1a   : > { %p1590_p11 = pnand %p1101_p9, %p1951_p1  ;;  %s1596_s26 = sshll.u32 %s1462_s25, 4  ;;  %s331_s26 = int_to_ptr.vmem [resolvable:$true] %s1596_s26 }
  0x1b   : > { %s1194_s29 = scalar_lea.hbm %s1940_s1, 512 }
  0x1c   : > { %p1195_p12 = scmp.ne.s32.totalorder %s1940_s1, %s1194_s29  ;;  %p1606_p13 = pneg %p1590_p11 }
  0x1d   : > { %p1201_p5 = scmp.lt.u32.totalorder %s1194_s29, %s1940_s1 }
  0x1e   : > { %p1197_p0 = pnand %p1606_p13, %p1195_p12 }
  0x20   : > { %p1198_p3 = pneg %p1197_p0 }
  0x22   : > { %p1203_p7 = pnand %p1201_p5, %p1198_p3 }
  0x24   : > { %1206 = shalt.err (!%p1203_p7)
}
  0x25   : > { %s1207_s16 = scalar_lea.vmem %s1583_s21, 512  ;;  %p1215_p2 = scmp.lt.s32.totalorder %s1583_s21, %s1583_s21 }
  0x26   : > { %p1208_p9 = scmp.ne.s32.totalorder %s1583_s21, %s1207_s16  ;;  %p1216_p6 = scmp.lt.s32.totalorder %s1207_s16, %s1207_s16 }
  0x28   : > { %p1210_p10 = pnand %p1208_p9, %p1606_p13  ;;  %p1217_p12 = por %p1216_p6, %p1215_p2 }
  0x2a   : > { %p1211_p1 = pneg %p1210_p10 }
  0x2c   : > { %p1218_p0 = pnand %p1217_p12, %p1211_p1 }
  0x2e   : > { %1221 = shalt.err (!%p1218_p0)
}
  0x2f   : > { %s1463_s27 = smov 128   ;;  %s1464_s28 = smov 8  }
  0x30   : > { %1104 = dma.hbm_to_vmem [thread:$0]  (!%p1590_p11), %s1940_s1, 512, %s1583_s21, [#allocation6], %s1463_s27, %s1463_s27, %s1464_s28  }
  0x31   : > { %s1222_s16 = scalar_lea.hbm %s1942_s3, 512 }
  0x32   : > { %p1223_p1 = scmp.ne.s32.totalorder %s1942_s3, %s1222_s16  ;;  %p1229_p10 = scmp.lt.u32.totalorder %s1222_s16, %s1942_s3 }
  0x34   : > { %p1225_p2 = pnand %p1223_p1, %p1606_p13 }
  0x36   : > { %p1226_p6 = pneg %p1225_p2 }
  0x38   : > { %p1231_p3 = pnand %p1229_p10, %p1226_p6 }
  0x3a   : > { %1234 = shalt.err (!%p1231_p3)
}
  0x3b   : > { %s1235_s21 = scalar_lea.vmem %s1594_s24, 512  ;;  %p1243_p12 = scmp.lt.s32.totalorder %s1594_s24, %s1594_s24 }
  0x3c   : > { %p1236_p5 = scmp.ne.s32.totalorder %s1594_s24, %s1235_s21  ;;  %p1244_p0 = scmp.lt.s32.totalorder %s1235_s21, %s1235_s21 }
  0x3e   : > { %p1238_p7 = pnand %p1236_p5, %p1606_p13  ;;  %p1245_p1 = por %p1244_p0, %p1243_p12 }
  0x40   : > { %p1239_p9 = pneg %p1238_p7 }
  0x42   : > { %p1246_p2 = pnand %p1245_p1, %p1239_p9 }
  0x44   : > { %1249 = shalt.err (!%p1246_p2)
}
  0x45   : > { %1107 = dma.hbm_to_vmem [thread:$0]  (!%p1590_p11), %s1942_s3, 512, %s1594_s24, [#allocation6], %s1463_s27, %s1463_s27, %s1464_s28  }
  0x46   : > { %s1250_s29 = scalar_lea.hbm %s1944_s5, 512 }
  0x47   : > { %p1251_p6 = scmp.ne.s32.totalorder %s1944_s5, %s1250_s29  ;;  %p1257_p5 = scmp.lt.u32.totalorder %s1250_s29, %s1944_s5 }
  0x49   : > { %p1253_p10 = pnand %p1251_p6, %p1606_p13 }
  0x4b   : > { %p1254_p3 = pneg %p1253_p10 }
  0x4d   : > { %p1259_p7 = pnand %p1257_p5, %p1254_p3 }
  0x4f   : > { %1262 = shalt.err (!%p1259_p7)
}
  0x50   : > { %s1263_s21 = scalar_lea.vmem %s331_s26, 512  ;;  %p1271_p1 = scmp.lt.s32.totalorder %s331_s26, %s331_s26 }
  0x51   : > { %p1264_p9 = scmp.ne.s32.totalorder %s331_s26, %s1263_s21  ;;  %p1272_p2 = scmp.lt.s32.totalorder %s1263_s21, %s1263_s21 }
  0x53   : > { %p1266_p12 = pnand %p1264_p9, %p1606_p13  ;;  %p1273_p4 = por %p1272_p2, %p1271_p1 }
  0x55   : > { %p1267_p0 = pneg %p1266_p12 }
  0x57   : > { %p1274_p8 = pnand %p1273_p4, %p1267_p0 }
  0x59   : > { %1277 = shalt.err (!%p1274_p8)
}
  0x5a   : > { %1110 = dma.hbm_to_vmem [thread:$0]  (!%p1590_p11), %s1944_s5, 512, %s331_s26, [#allocation9], %s1463_s27, %s1463_s27, %s1464_s28  }
  0x5b   : > { %s52_s18 = sadd.s32 1, %s1446_s11  ;;  %s43_s22 = sadd.s32 1, %s1454_s13 }
  0x5c   : > { %p59_p4 = scmp.ne.s32.totalorder %s1446_s11, %s1442_s10  ;;  %p45_p8 = scmp.ge.s32.totalorder %s43_s22, 2 }
  0x5d   : > { %p60_p13 = scmp.eq.s32.totalorder %s1458_s14, 0  ;;  %p1970_p6 = scmp.eq.s32.totalorder %s1558_s15, 1 }
  0x5e   : > { %p1128_p3 = scmp.lt.s32.totalorder %s1458_s14, 2  ;;  %s1996_s22 = smov (%p45_p8, %s43_s22), 0 }
  0x5f   : > { %p1685_p10 = por %p1970_p6, %p59_p4  ;;  %p61_p5 = por %p60_p13, %p59_p4 }
  0x60   : > { %s347_s9 = sand.u32 1, %s1446_s11   ;;  %s47_s30 = ssub.s32 %s1454_s13, %s1996_s22 }
  0x61   : > { %p50_p7 = scmp.eq.s32.totalorder %s47_s30, 0  ;;  %s976_s26 = sshll.u32 %s347_s9, 3 }
  0x62   : > { %s977_s27 = sshll.u32 %s1454_s13, 7  ;;  %s351_s25 = scalar_lea.vmem [#allocation2], %s976_s26 }
  0x63   : > { %s1697_s28 = scalar_select %p50_p7, %s1446_s11, %s52_s18  }
  0x64   : > { %s1702_s23 = scalar_lea.hbm %s1939_s0, %s977_s27  ;;  %s359_s16 = sshll.u32 %s351_s25, 4  ;;  %s1704_s16 = int_to_ptr.vmem [resolvable:$true] %s359_s16 }
  0x65   : > { %p1708_p11 = pnand %p1128_p3, %p61_p5  ;;  %s348_s24 = scalar_lea.sflag [#allocation3], %s347_s9 }
  0x66   : > { %s1278_s7 = scalar_lea.hbm %s1702_s23, 128  ;;  %s1283_s26 = scalar_lea.hbm %s1939_s0, 256 }
  0x67   : > { %p1279_p9 = scmp.ne.s32.totalorder %s1702_s23, %s1278_s7  ;;  %p1280_p12 = pneg %p1708_p11 }
  0x68   : > { %p1284_p2 = scmp.lt.u32.totalorder %s1702_s23, %s1939_s0  ;;  %p1285_p4 = scmp.lt.u32.totalorder %s1283_s26, %s1278_s7 }
  0x69   : > { %p1281_p0 = pnand %p1280_p12, %p1279_p9  ;;  %p1287_p13 = scmp.lt.u32.totalorder %s1278_s7, %s1702_s23 }
  0x6a   : > { %p1286_p8 = por %p1285_p4, %p1284_p2 }
  0x6b   : > { %p1282_p1 = pneg %p1281_p0 }
  0x6c   : > { %p1288_p6 = por %p1287_p13, %p1286_p8 }
  0x6e   : > { %p1289_p3 = pnand %p1288_p6, %p1282_p1 }
  0x70   : > { %1292 = shalt.err (!%p1289_p3)
}
  0x71   : > { %s1293_s9 = scalar_lea.vmem %s1704_s16, 128  ;;  %s1465_s20 = smov [#allocation2]  }
  0x72   : > { %p1294_p5 = scmp.ne.s32.totalorder %s1704_s16, %s1293_s9  ;;  %s1298_s25 = sshll.u32 %s1465_s20, 4  ;;  %s1299_s25 = int_to_ptr.vmem [resolvable:$false] %s1298_s25 }
  0x73   : > { %s1300_s18 = scalar_lea.vmem %s1299_s25, 256  ;;  %p1301_p0 = scmp.lt.s32.totalorder %s1704_s16, %s1299_s25 }
  0x74   : > { %p1296_p7 = pnand %p1294_p5, %p1280_p12  ;;  %p1302_p2 = scmp.lt.s32.totalorder %s1300_s18, %s1293_s9 }
  0x76   : > { %p1297_p9 = pneg %p1296_p7  ;;  %p1303_p4 = por %p1302_p2, %p1301_p0 }
  0x78   : > { %p1304_p8 = pnand %p1303_p4, %p1297_p9 }
  0x7a   : > { %1307 = shalt.err (!%p1304_p8)
}
  0x7b   : > { %1114 = dma.hbm_to_vmem [thread:$0]  (!%p1708_p11), %s1702_s23, 128, %s1704_s16, %s348_s24  }
  0x7c   : > { %p1973_p1 = scmp.ne.s32.totalorder %s1967_s19, 0 }
  0x7d   : > { %s1740_s7 = sand.u32 (!%p1973_p1), 1, %s1442_s10   ;;  %p1974_p12 = scmp.ne.s32.totalorder (!%p1973_p1), %s1964_s17, 0 }
  0x7e   : > { %368 = sbr.rel (%p1973_p1) target bundleno = 548 (0x224), region = 48  ;;  %s979_s30 = sshll.u32 (!%p1973_p1), %s1740_s7, 3 }
  0x7f   : > { %s371_s26 = scalar_lea.sflag (!%p1973_p1), [#allocation3], %s1740_s7  ;;  %s1744_s27 = scalar_lea.vmem (!%p1973_p1), [#allocation2], %s979_s30 }
  0x85   : > { %1417 = dma.done.wait (%p1974_p12), %s371_s26, 128  }
  0x86   : > { %1419 = vsyncadd (%p1974_p12), %s371_s26, 4294967168  ;;  %p1975_p11 = scmp.eq.s32.totalorder %s1558_s15, 0 }
  0x88   : > { %1421 = dma.done.wait (%p1975_p11), [#allocation6], 1024   ;;  %p1976_p13 = pmov %p1975_p11 }
  0x89   : > { %p1977_p6 = pmov %p1975_p11 }
  0x8a   : > { %1423 = vsyncadd (%p1976_p13), [#allocation6], 4294966272 }
  0x8b   : > { %1425 = dma.done.wait (%p1977_p6), [#allocation9], 512   ;;  %p1978_p3 = pmov %p1977_p6 }
  0x8c   : > { %v1466_v0 = vmov 0.0|0.0   ;;  %vm1467_vm0 = vmmov 0   ;;  %v1468_v1 = vmov 0.0   ;;  %v432_v2 = vld [vmem:[#allocation5] sm:$0xff]  ;;  %v433_v3 = vld [vmem:[#allocation5 + $0x8] sm:$0xff]  ;;  %v434_v7 = vld [vmem:[#allocation5 + $0x10] sm:$0xff] }
  0x8d   : > { %1427 = vsyncadd (%p1978_p3), [#allocation9], 4294966784  ;;  %1063 = vmatprep.subr.bf16.mxu0 %v1466_v0  ;;  %1069 = vmatprep.subr.bf16.mxu1 %v1466_v0  ;;  %v517_v4 = vld [vmem:[#allocation7] sm:$0xff]  ;;  %v1064_v5 = vpack.c.bf16 %v433_v3, %v432_v2  ;;  %v518_v6 = vld [vmem:[#allocation7 + $0x8] sm:$0xff]  ;;  %vm443_vm1 = vcmask 261120   ;;  %s983_s17 = sshll.u32 %s1740_s7, 5 }
  0x8e   : > { %1038 = vmatprep.mubr.msk.f32.mxu0 %vm1467_vm0, %v1468_v1  ;;  %1049 = vmatprep.mubr.msk.f32.mxu1 %vm1467_vm0, %v1468_v1  ;;  %v435_v8 = vld [vmem:[#allocation5 + $0x18] sm:$0xff]  ;;  %v1070_v9 = vpack.c.bf16 %v518_v6, %v517_v4  ;;  %v519_v10 = vld [vmem:[#allocation7 + $0x10] sm:$0xff]  ;;  %v598_v14 = vld [vmem:[#allocation8] sm:$0xff]  ;;  %vm680_vm2 = vcmask 64512   ;;  %s1769_s24 = scalar_lea.vmem [#allocation11], %s983_s17  ;;  %s1469_s29 = smov 104  }
  0x8f   : > { %v520_v11 = vld [vmem:[#allocation7 + $0x18] sm:$0xff]  ;;  %1065 = vmatpush3.bf16.msra.mxu0 %v1064_v5  ;;  %v1067_v12 = vpack.c.bf16 %v435_v8, %v434_v7  ;;  %v599_v15 = vld [vmem:[#allocation8 + $0x8] sm:$0xff]  ;;  %v600_v18 = vld [vmem:[#allocation8 + $0x10] sm:$0xff]  ;;  %s1470_s9 = smov 120   ;;  %s1773_s20 = scalar_lea.vmem [#allocation10], %s983_s17 }
  0x90   : > { %1071 = vmatpush3.bf16.msra.mxu1 %v1070_v9  ;;  %1066 = vmatprep.subr.bf16.mxu0 %v1466_v0  ;;  %v1073_v13 = vpack.c.bf16 %v520_v11, %v519_v10  ;;  %v431_v16 = vld [vmem:[%s1744_s27] sm:$0xff]  ;;  %v1076_v17 = vpack.c.bf16 %v599_v15, %v598_v14  ;;  %s1471_s30 = smov 112   ;;  %s1780_s26 = scalar_lea.vmem [#allocation13], %s983_s17 }
  0x91   : > { %1072 = vmatprep.subr.bf16.mxu1 %v1466_v0  ;;  %v601_v19 = vld [vmem:[#allocation8 + $0x18] sm:$0xff]  ;;  %v986_v21 = vld [vmem:[%s1941_s2] ss:$0 sm:$0xff]  ;;  %s774_s27 = sshll.u32 %s1769_s24, 4  ;;  %s737_s19 = sand.u32 1, %s1558_s15   ;;  %s1789_s27 = int_to_ptr.vmem [resolvable:$true] %s774_s27 }
  0x92   : > { %v1079_v20 = vpack.c.bf16 %v601_v19, %v600_v18  ;;  %v988_v22 = vld [vmem:[%s1943_s4] ss:$0 sm:$0xff]  ;;  %s1787_s23 = sshll.u32 %s1450_s12, 9  ;;  %s1979_s21 = sld [smem:[#allocation22_spill]] }
  0x93   : > { %1068 = vmatpush3.bf16.msra.mxu0 %v1067_v12  ;;  %v990_v30 = vld [vmem:[%s1945_s6] ss:$0 sm:$0xff]  ;;  %s1805_s12 = scalar_lea.sflag [#allocation12], %s737_s19  ;;  %s1308_s15 = scalar_lea.vmem %s1789_s27, 512 }
  0x94   : > { %1074 = vmatpush3.bf16.msra.mxu1 %v1073_v13  ;;  %1075 = vmatprep.subr.bf16.mxu0 %v1466_v0  ;;  %p1309_p5 = scmp.ne.s32.totalorder %s1789_s27, %s1308_s15 }
  0x96   : > { %1039 = vmatmul.mubr.msk.f32.vlgmr.msra.gmra.mrb[0].mxu0 %vm443_vm1, %v431_v16  ;;  %p1310_p7 = pnand %p1309_p5, %p1685_p10 }
  0x97   : > { %1050 = vmatmul.mubr.msk.f32.vlgmr.msra.gmra.mrb[0].mxu1 %vm443_vm1, %v431_v16  ;;  %1077 = vmatpush3.bf16.msra.mxu0 %v1076_v17 }
  0x98   : > { %1078 = vmatprep.subr.bf16.mxu0 %v1466_v0  ;;  %1060 = vmatprep.mubr.msk.f32.mxu0 %vm1467_vm0, %v1468_v1  ;;  %p1311_p9 = pneg %p1310_p7 }
  0x9b   : > { %1080 = vmatpush3.bf16.msra.mxu0 %v1079_v20 }
  0x9e   : > { %1061 = vmatmul.mubr.msk.f32.vlgmr.msra.gmra.mrb[2].mxu0 %vm443_vm1, %v431_v16 }
 0x169   : > { %v513_v23 = vpop.f32.mrb[0].mxu0 }
 0x16a   : > { %v514_v24 = vadd.f32 %v986_v21, %v513_v23  ;;  %v594_v25 = vpop.f32.mrb[0].mxu1  ;;  %v1040_v26 = vpop.f32.mrb[1].mxu0 }
 0x16b   : > { %v595_v27 = vadd.f32 %v988_v22, %v594_v25  ;;  %v1051_v28 = vpop.f32.mrb[1].mxu1 }
 0x16c   : > { %v679_v29 = vmul.f32 0.35355338, %v514_v24 }
 0x16d   : > { %682 = vst.msk [vmem:[%s1769_s24] sm:$0xff] %vm680_vm2, %v595_v27  ;;  %722 = vrot.lane.b32.xlu1 %v595_v27, %s1469_s29  ;;  %691 = vrot.lane.b32.xlu0 %v595_v27, %s1470_s9 }
 0x16e   : > { %681 = vst.msk [vmem:[%s1773_s20] sm:$0xff] %vm680_vm2, %v679_v29 }
 0x171   : > { %707 = vrot.lane.b32.xlu0 %v595_v27, %s1471_s30  ;;  %685 = vrot.lane.b32.xlu1 %v679_v29, %s1470_s9  ;;  %v675_v31 = vpop.f32.mrb[2].mxu0 }
 0x172   : > { %v676_v32 = vadd.f32 %v990_v30, %v675_v31  ;;  %v1062_v33 = vpop.f32.mrb[3].mxu0 }
 0x174   : > { %683 = vst.msk [vmem:[%s1780_s26] sm:$0xff] %vm680_vm2, %v676_v32 }
 0x175   : > { %702 = vrot.lane.b32.xlu1 %v679_v29, %s1471_s30  ;;  %697 = vrot.lane.b32.xlu0 %v676_v32, %s1470_s9  ;;  %s1472_s9 = smov [#allocation11]  }
 0x176   : > { %s1312_s25 = sshll.u32 %s1472_s9, 4  ;;  %s1313_s25 = int_to_ptr.vmem [resolvable:$false] %s1312_s25 }
 0x177   : > { %s1314_s18 = scalar_lea.vmem %s1313_s25, 1024  ;;  %p1315_p0 = scmp.lt.s32.totalorder %s1789_s27, %s1313_s25 }
 0x178   : > { %p1316_p2 = scmp.lt.s32.totalorder %s1314_s18, %s1308_s15 }
 0x179   : > { %717 = vrot.lane.b32.xlu1 %v679_v29, %s1469_s29  ;;  %712 = vrot.lane.b32.xlu0 %v676_v32, %s1471_s30 }
 0x17a   : > { %p1317_p4 = por %p1316_p2, %p1315_p0 }
 0x17c   : > { %p1318_p8 = pnand %p1317_p4, %p1311_p9 }
 0x17d   : > { %727 = vrot.lane.b32.xlu0 %v676_v32, %s1469_s29  ;;  %s1799_s29 = scalar_lea.hbm %s1979_s21, %s1787_s23 }
 0x1df   : > { %v723_v34 = vpop.permute.xlu1 %722  ;;  %v692_v35 = vpop.permute.xlu0 %691 }
 0x1e0   : > { %999 = vst.msk [vmem:[%s1769_s24 + $0x18] sm:$0xff] %vm680_vm2, %v723_v34  ;;  %993 = vst.msk [vmem:[%s1769_s24 + $0x8] sm:$0xff] %vm680_vm2, %v692_v35 }
 0x1e3   : > { %v708_v36 = vpop.permute.xlu0 %707  ;;  %v686_v37 = vpop.permute.xlu1 %685 }
 0x1e4   : > { %996 = vst.msk [vmem:[%s1769_s24 + $0x10] sm:$0xff] %vm680_vm2, %v708_v36  ;;  %992 = vst.msk [vmem:[%s1773_s20 + $0x8] sm:$0xff] %vm680_vm2, %v686_v37 }
 0x1e5   : > { %1321 = shalt.err (!%p1318_p8)
}
 0x1e6   : > { %s1322_s24 = scalar_lea.hbm %s1799_s29, 512  ;;  %s1326_s17 = scalar_lea.hbm %s1979_s21, 1024 }
 0x1e7   : > { %p1323_p1 = scmp.ne.s32.totalorder %s1799_s29, %s1322_s24  ;;  %p1327_p13 = scmp.lt.u32.totalorder %s1799_s29, %s1979_s21 }
 0x1e8   : > { %p1328_p6 = scmp.lt.u32.totalorder %s1326_s17, %s1322_s24  ;;  %p1330_p5 = scmp.lt.u32.totalorder %s1322_s24, %s1799_s29 }
 0x1e9   : > { %p1324_p12 = pnand %p1323_p1, %p1685_p10 }
 0x1ea   : > { %p1329_p3 = por %p1328_p6, %p1327_p13 }
 0x1eb   : > { %p1325_p11 = pneg %p1324_p12 }
 0x1ec   : > { %p1331_p7 = por %p1330_p5, %p1329_p3 }
 0x1ee   : > { %p1332_p9 = pnand %p1331_p7, %p1325_p11 }
 0x1f0   : > { %1335 = shalt.err (!%p1332_p9)
}
 0x1f1   : > { %s1958_s15 = smov 128   ;;  %s1474_s25 = smov 8   ;;  %v703_v38 = vpop.permute.xlu1 %702  ;;  %v698_v39 = vpop.permute.xlu0 %697 }
 0x1f2   : > { %1096 = dma.vmem_to_hbm [thread:$0]  (%p1685_p10), %s1789_s27, 512, %s1799_s29, %s1805_s12, %s1958_s15, %s1958_s15, %s1474_s25  }
 0x1f3   : > { %s757_s18 = sshll.u32 %s1773_s20, 4  ;;  %995 = vst.msk [vmem:[%s1773_s20 + $0x10] sm:$0xff] %vm680_vm2, %v703_v38  ;;  %994 = vst.msk [vmem:[%s1780_s26 + $0x8] sm:$0xff] %vm680_vm2, %v698_v39  ;;  %s1980_s19 = sld [smem:[#allocation21_spill]]  ;;  %s1837_s18 = int_to_ptr.vmem [resolvable:$true] %s757_s18 }
 0x1f4   : > { %s1336_s29 = scalar_lea.vmem %s1837_s18, 512  ;;  %s1475_s9 = smov [#allocation10]  }
 0x1f5   : > { %v718_v40 = vpop.permute.xlu1 %717  ;;  %v713_v41 = vpop.permute.xlu0 %712  ;;  %p1337_p0 = scmp.ne.s32.totalorder %s1837_s18, %s1336_s29  ;;  %s1340_s24 = sshll.u32 %s1475_s9, 4  ;;  %s1341_s24 = int_to_ptr.vmem [resolvable:$false] %s1340_s24 }
 0x1f6   : > { %998 = vst.msk [vmem:[%s1773_s20 + $0x18] sm:$0xff] %vm680_vm2, %v718_v40  ;;  %997 = vst.msk [vmem:[%s1780_s26 + $0x10] sm:$0xff] %vm680_vm2, %v713_v41  ;;  %s1342_s30 = scalar_lea.vmem %s1341_s24, 1024  ;;  %p1343_p8 = scmp.lt.s32.totalorder %s1837_s18, %s1341_s24 }
 0x1f7   : > { %p1338_p2 = pnand %p1337_p0, %p1685_p10  ;;  %p1344_p1 = scmp.lt.s32.totalorder %s1342_s30, %s1336_s29 }
 0x1f9   : > { %s1843_s17 = scalar_lea.hbm %s1980_s19, %s1787_s23  ;;  %p1339_p4 = pneg %p1338_p2 }
 0x1fa   : > { %p1345_p12 = por %p1344_p1, %p1343_p8 }
 0x1fc   : > { %p1346_p11 = pnand %p1345_p12, %p1339_p4 }
 0x1fe   : > { %1349 = shalt.err (!%p1346_p11)
}
 0x1ff   : > { %s1350_s20 = scalar_lea.hbm %s1843_s17, 512  ;;  %s1354_s9 = scalar_lea.hbm %s1980_s19, 1024 }
 0x200   : > { %p1351_p13 = scmp.ne.s32.totalorder %s1843_s17, %s1350_s20  ;;  %p1355_p5 = scmp.lt.u32.totalorder %s1843_s17, %s1980_s19 }
 0x201   : > { %p1356_p7 = scmp.lt.u32.totalorder %s1354_s9, %s1350_s20  ;;  %p1358_p0 = scmp.lt.u32.totalorder %s1350_s20, %s1843_s17 }
 0x202   : > { %p1352_p6 = pnand %p1351_p13, %p1685_p10 }
 0x203   : > { %p1357_p9 = por %p1356_p7, %p1355_p5 }
 0x204   : > { %p1353_p3 = pneg %p1352_p6 }
 0x205   : > { %p1359_p2 = por %p1358_p0, %p1357_p9 }
 0x207   : > { %p1360_p4 = pnand %p1359_p2, %p1353_p3 }
 0x209   : > { %1363 = shalt.err (!%p1360_p4)
}
 0x20a   : > { %s1981_s29 = smov 128   ;;  %s1982_s30 = scalar_lea.sflag [#allocation4], %s1740_s7  ;;  %v728_v42 = vpop.permute.xlu0 %727 }
 0x20b   : > { %1095 = dma.vmem_to_hbm [thread:$0]  (%p1685_p10), %s1837_s18, 512, %s1843_s17, %s1982_s30, %s1981_s29, %s1981_s29, %s1474_s25  }
 0x20c   : > { %s1983_s15 = sshll.u32 %s1780_s26, 4  ;;  %s1984_s20 = sld [smem:[#allocation23_spill]]  ;;  %1000 = vst.msk [vmem:[%s1780_s26 + $0x18] sm:$0xff] %vm680_vm2, %v728_v42  ;;  %s1879_s15 = int_to_ptr.vmem [resolvable:$true] %s1983_s15 }
 0x20d   : > { %s1364_s7 = scalar_lea.vmem %s1879_s15, 512  ;;  %s1476_s18 = smov [#allocation13]  }
 0x20e   : > { %p1365_p8 = scmp.ne.s32.totalorder %s1879_s15, %s1364_s7  ;;  %s1368_s17 = sshll.u32 %s1476_s18, 4  ;;  %s1369_s17 = int_to_ptr.vmem [resolvable:$false] %s1368_s17 }
 0x20f   : > { %s1370_s24 = scalar_lea.vmem %s1369_s17, 1024  ;;  %p1371_p11 = scmp.lt.s32.totalorder %s1879_s15, %s1369_s17 }
 0x210   : > { %p1366_p1 = pnand %p1365_p8, %p1685_p10  ;;  %p1372_p13 = scmp.lt.s32.totalorder %s1370_s24, %s1364_s7 }
 0x212   : > { %s1885_s9 = scalar_lea.hbm %s1984_s20, %s1787_s23  ;;  %p1367_p12 = pneg %p1366_p1 }
 0x213   : > { %p1373_p6 = por %p1372_p13, %p1371_p11 }
 0x215   : > { %p1374_p3 = pnand %p1373_p6, %p1367_p12 }
 0x217   : > { %1377 = shalt.err (!%p1374_p3)
}
 0x218   : > { %s1378_s26 = scalar_lea.hbm %s1885_s9, 512  ;;  %s1382_s16 = scalar_lea.hbm %s1984_s20, 1024 }
 0x219   : > { %p1379_p5 = scmp.ne.s32.totalorder %s1885_s9, %s1378_s26  ;;  %p1383_p0 = scmp.lt.u32.totalorder %s1885_s9, %s1984_s20 }
 0x21a   : > { %p1384_p2 = scmp.lt.u32.totalorder %s1382_s16, %s1378_s26  ;;  %p1386_p8 = scmp.lt.u32.totalorder %s1378_s26, %s1885_s9 }
 0x21b   : > { %p1380_p7 = pnand %p1379_p5, %p1685_p10 }
 0x21c   : > { %p1385_p4 = por %p1384_p2, %p1383_p0 }
 0x21d   : > { %p1381_p9 = pneg %p1380_p7 }
 0x21e   : > { %p1387_p1 = por %p1386_p8, %p1385_p4 }
 0x220   : > { %p1388_p12 = pnand %p1387_p1, %p1381_p9 }
 0x222   : > { %1391 = shalt.err (!%p1388_p12)
}
 0x223   : > { %1097 = dma.vmem_to_hbm [thread:$0]  (%p1685_p10), %s1879_s15, 512, %s1885_s9, %s1805_s12, %s1981_s29, %s1981_s29, %s1474_s25  }
 0x224 PF: > { %s1985_s7 = sld [smem:[#allocation19_spill]]  ;;  %s1986_s17 = sld [smem:[#allocation20_spill]] }
 0x225   : > { %p1988_p13 = scmp.ge.s32.totalorder %s1458_s14, 2 }
 0x22a   : > { %s806_s24 = sand.u32 1, %s1985_s7   ;;  %p1987_p11 = scmp.ne.s32.totalorder %s1986_s17, 0 }
 0x22b   : > { %s807_s26 = scalar_lea.sflag [#allocation4], %s806_s24 }
 0x22c   : > { %p1116_p6 = pnand %p1988_p13, %p1987_p11 }
 0x22e   : > { %1429 = dma.done.wait (!%p1116_p6), %s807_s26, 512  }
 0x22f   : > { %1431 = vsyncadd (!%p1116_p6), %s807_s26, 4294966784  ;;  %s1989_s8 = sadd.s32 4294967294, %s1458_s14  }
 0x230   : > { %s815_s23 = sand.u32 1, %s1989_s8  }
 0x231   : > { %s816_s30 = scalar_lea.sflag [#allocation12], %s815_s23 }
 0x232   : > { %1433 = dma.done.wait (!%p1116_p6), %s816_s30, 1024  }
 0x233   : > { %1435 = vsyncadd (!%p1116_p6), %s816_s30, 4294966272  ;;  %s31_s14 = sadd.s32 1, %s1458_s14   ;;  %s1990_s30 = smov %s1442_s10 }
 0x234   : > { %p28_p10 = scmp.ge.s32.totalorder %s31_s14, 4   ;;  %s1991_s10 = smov %s1446_s11 }
 0x235   : > { %s1992_s11 = smov %s1697_s28  ;;  %s1993_s12 = smov %s1454_s13 }
 0x236   : > { %s1994_s13 = smov %s1996_s22  ;;  %30 = sbr.rel (!%p28_p10) target bundleno = 14 (0xe), region = 146 }
 0x23d   :  { %830 = vsyncpa [#allocation3], 1 }
 0x23e   :  { %832 = vsyncpa [#allocation3 + $0x1], 1 }
 0x23f   :  { %833 = vsyncpa [#allocation6], 1 }
 0x240   :  { %834 = vsyncpa [#allocation9], 1 }
 0x241   :  { %835 = vsyncpa [#allocation4], 1 }
 0x242   :  { %837 = vsyncpa [#allocation4 + $0x1], 1 }
 0x243   :  { %838 = vsyncpa [#allocation12], 1 }
 0x244   :  { %840 = vsyncpa [#allocation12 + $0x1], 1 }

</bundles_post_ra>
